<compile_context>
chip_gen: v7x
topology: tpu7x:2x2x1
jax: 0.10.0
libtpu: 0.0.40
codegen_flags: <defaults>
</compile_context>

<pallas_src>
import functools

import jax
import jax.numpy as jnp
import numpy as np
from jax.experimental import pallas as pl
from jax.experimental.pallas import tpu as pltpu


def _f16_round_trip(x, bitcast_fn):
    """Emulates x.to(float16).to(float32) (round-to-nearest-even) for positive
    normal-range values via integer bit ops; reproduces scale_dtype=float16
    without relying on f16 support in Mosaic.
    # TODO(synk): f16 subnormal/overflow behavior of the cast not emulated
    #             (quant scales here are well inside the f16 normal range)."""
    bits = bitcast_fn(x, jnp.uint32)
    lsb = (bits >> 13) & jnp.uint32(1)
    bits = (bits + jnp.uint32(0x0FFF) + lsb) & jnp.uint32(0xFFFFE000)
    return bitcast_fn(bits, jnp.float32)


def _quant_dequant_kernel(w_ref, v_ref, mins_ref, maxs_ref, wq_ref, *, maxq, gs):
    # w/v : (tkx, tnn) f32, quant groups = `gs` consecutive rows of a column.
    # mins/maxs : (tkx//gs, tnn) f32 (one row per group).
    # wq  : (tkx, tnn) bf16 (lane-dense output).
    ngroups = w_ref.shape[0] // gs
    for gi in range(ngroups):                    # static unroll (bounded by tile picker)
        rows = slice(gi * gs, (gi + 1) * gs)
        wg = w_ref[rows, :]                      # (gs, tnn)
        vg = v_ref[rows, :]
        # forward() clamps min_scale / max_scale into [0, 1] in place
        mins = jnp.clip(mins_ref[gi:gi + 1, :], 0.0, 1.0)   # (1, tnn)
        maxs = jnp.clip(maxs_ref[gi:gi + 1, :], 0.0, 1.0)

        # quant_weight_asym, tensor min_scale/max_scale branch
        wmin_tmp = jnp.minimum(jnp.min(wg, axis=0, keepdims=True), 0.0) * mins
        wmax_tmp = jnp.maximum(jnp.max(wg, axis=0, keepdims=True), 0.0) * maxs
        wmax = jnp.maximum(wmax_tmp, wmin_tmp)
        wmin = jnp.minimum(wmax_tmp, wmin_tmp)
        deg = jnp.logical_and(wmin == 0.0, wmax == 0.0)
        wmin = jnp.where(deg, -1.0, wmin)
        wmax = jnp.where(deg, 1.0, wmax)

        scale = _f16_round_trip((wmax - wmin) / maxq, pltpu.bitcast)  # fp16 scale
        zp = jnp.round(-wmin / scale)            # round_ste forward == round
        int_w = jnp.round(wg / scale + vg)       # keep divide: bit-exact vs torch
        q = jnp.clip(int_w + zp, 0.0, maxq)
        wq_ref[rows, :] = (scale * (q - zp)).astype(wq_ref.dtype)


def _matmul_kernel(x_ref, w_ref, b_ref, o_ref, acc_ref):
    # x: (tm, tk) bf16, w: (tk, tn) bf16, b: (1, tn) f32 -> o: (tm, tn) f32.
    @pl.when(pl.program_id(2) == 0)
    def _init():
        acc_ref[...] = jnp.zeros_like(acc_ref)

    acc_ref[...] += jnp.dot(x_ref[...], w_ref[...],
                            preferred_element_type=jnp.float32)

    @pl.when(pl.program_id(2) == pl.num_programs(2) - 1)
    def _finalize():
        o_ref[...] = (acc_ref[...] + b_ref[...]).astype(o_ref.dtype)


def _pick_tile(dim, candidates):
    """Largest candidate that evenly divides `dim`; else the full dim."""
    for c in candidates:
        if c <= dim and dim % c == 0:
            return c
    return dim


def _pick_quant_row_tile(nx, gs):
    # Row tile must hold whole groups and keep the (tile//gs, tnn) scale block
    # sublane-aligned (multiple of 8) unless it covers the full dim.
    cands = [c for c in (1024, 512, 256, 128)
             if c % gs == 0 and (c // gs) % 8 == 0]
    return _pick_tile(nx, cands)


def wrapper_transformer_conv1d_forward(x, weight, bias, value, min_scale,
                                       max_scale, num_bits=4, group_size=-1):
    """Forward of WrapperTransformerConv1d (asym quantization path)."""
    # TODO(synk): sym=True branch (quant_weight_sym) not implemented; the
    #             module default path (sym=False) is what is used here.
    nx, nf = weight.shape
    maxq = float(2 ** num_bits - 1)

    if group_size == -1 or nx < group_size:
        gs = nx                                  # one group per weight_t row
    else:
        # TODO(synk): padding path for nx % group_size != 0 not implemented.
        assert nx % group_size == 0
        gs = group_size
    ngc = nx // gs                               # groups per column

    # Layout plumbing (pure XLA glue, metadata/tiny transposes): keep the
    # weight in its native (nx, nf) layout so quant groups are sublane runs
    # and the matmul is a plain NN contraction (no in-kernel transpose).
    w_nn = weight.astype(jnp.float32)                                  # (nx, nf)
    v_nn = jnp.transpose(value.astype(jnp.float32))                    # (nf,nx)->(nx,nf)
    mins_nn = jnp.transpose(min_scale.astype(jnp.float32).reshape(nf, ngc))
    maxs_nn = jnp.transpose(max_scale.astype(jnp.float32).reshape(nf, ngc))

    # ---- kernel 1: tiled, lane-dense quant-dequant -> bf16 (nx, nf) ----
    tkx = _pick_quant_row_tile(nx, gs)
    tnn = _pick_tile(nf, (512, 256, 128))
    wq = pl.pallas_call(
        functools.partial(_quant_dequant_kernel, maxq=maxq, gs=gs),
        out_shape=jax.ShapeDtypeStruct((nx, nf), jnp.bfloat16),
        grid_spec=pltpu.PrefetchScalarGridSpec(
            num_scalar_prefetch=0,
            grid=(nx // tkx, nf // tnn),
            in_specs=[pl.BlockSpec((tkx, tnn), lambda i, j: (i, j)),
                      pl.BlockSpec((tkx, tnn), lambda i, j: (i, j)),
                      pl.BlockSpec((tkx // gs, tnn), lambda i, j: (i, j)),
                      pl.BlockSpec((tkx // gs, tnn), lambda i, j: (i, j))],
            out_specs=pl.BlockSpec((tkx, tnn), lambda i, j: (i, j))),
        compiler_params=pltpu.CompilerParams(
            dimension_semantics=("parallel", "parallel")),
    )(w_nn, v_nn, mins_nn, maxs_nn)

    # ---- kernel 2: tiled bf16 matmul + bias (f32 accumulate) ----
    M = int(np.prod(x.shape[:-1]))
    x2 = x.reshape(M, nx).astype(jnp.bfloat16)   # bf16 MXU operands
    b2 = bias.reshape(1, nf).astype(jnp.float32)

    tm = _pick_tile(M, (256, 128))
    tn = _pick_tile(nf, (512, 256, 128))
    tk = _pick_tile(nx, (512, 256, 128))
    out = pl.pallas_call(
        _matmul_kernel,
        out_shape=jax.ShapeDtypeStruct((M, nf), jnp.float32),
        grid_spec=pltpu.PrefetchScalarGridSpec(
            num_scalar_prefetch=0,
            grid=(M // tm, nf // tn, nx // tk),
            in_specs=[pl.BlockSpec((tm, tk), lambda i, j, k: (i, k)),
                      pl.BlockSpec((tk, tn), lambda i, j, k: (k, j)),
                      pl.BlockSpec((1, tn), lambda i, j, k: (0, j))],
            out_specs=pl.BlockSpec((tm, tn), lambda i, j, k: (i, j)),
            scratch_shapes=[pltpu.VMEM((tm, tn), jnp.float32)]),
        compiler_params=pltpu.CompilerParams(
            dimension_semantics=("parallel", "parallel", "arbitrary")),
    )(x2, wq, b2)

    return out.reshape(x.shape[:-1] + (nf,))


def _ref_forward(x, weight, bias, value, min_scale, max_scale, num_bits, group_size):
    """Pure-JAX f32 reference with torch semantics (for correctness check)."""
    nx, nf = weight.shape
    weight_t = weight.T
    maxq = float(2 ** num_bits - 1)
    if group_size == -1 or nx < group_size:
        wg, vg = weight_t, value
    else:
        wg = weight_t.reshape(-1, group_size)
        vg = value.reshape(-1, group_size)
    G = wg.shape[0]
    mins = jnp.clip(min_scale, 0.0, 1.0).reshape(G, 1)
    maxs = jnp.clip(max_scale, 0.0, 1.0).reshape(G, 1)
    wmin_tmp = jnp.minimum(jnp.min(wg, axis=1, keepdims=True), 0.0) * mins
    wmax_tmp = jnp.maximum(jnp.max(wg, axis=1, keepdims=True), 0.0) * maxs
    wmax = jnp.maximum(wmax_tmp, wmin_tmp)
    wmin = jnp.minimum(wmax_tmp, wmin_tmp)
    deg = (wmin == 0.0) & (wmax == 0.0)
    wmin = jnp.where(deg, -1.0, wmin)
    wmax = jnp.where(deg, 1.0, wmax)
    scale = _f16_round_trip((wmax - wmin) / maxq, jax.lax.bitcast_convert_type)
    zp = jnp.round(-wmin / scale)
    int_w = jnp.round(wg / scale + vg)
    q = jnp.clip(int_w + zp, 0.0, maxq)
    wq = (scale * (q - zp)).reshape(nf, nx)
    x2 = x.reshape(-1, nx)
    out = jnp.dot(x2, wq.T, precision=jax.lax.Precision.HIGHEST) + bias
    return out.reshape(x.shape[:-1] + (nf,))


def _run_case(key, batch, seq, nx, nf, num_bits, group_size, rtol, atol):
    k_w, k_b, k_x = jax.random.split(key, 3)
    G = nf * (nx // group_size) if (group_size != -1 and nx >= group_size) else nf
    weight = 0.02 * jax.random.normal(k_w, (nx, nf), dtype=jnp.float32)
    bias = 0.01 * jax.random.normal(k_b, (nf,), dtype=jnp.float32)
    x = jax.random.normal(k_x, (batch, seq, nx), dtype=jnp.float32)

    # Parameters exactly as in WrapperTransformerConv1d.__init__ :
    value = jnp.zeros((nf, nx), dtype=jnp.float32)   # self.value (weight_t shape)
    min_scale = jnp.ones((G,), dtype=jnp.float32)    # self.min_scale
    max_scale = jnp.ones((G,), dtype=jnp.float32)    # self.max_scale

    out = wrapper_transformer_conv1d_forward(
        x, weight, bias, value, min_scale, max_scale, num_bits, group_size)
    out = jax.block_until_ready(out)

    ref = _ref_forward(x, weight, bias, value, min_scale, max_scale,
                       num_bits, group_size)
    np.testing.assert_allclose(np.asarray(out), np.asarray(ref),
                               rtol=rtol, atol=atol)


if __name__ == "__main__":
    key = jax.random.PRNGKey(0)
    k1, k2 = jax.random.split(key)

    # Small config (degenerate 1x1x1 grid), same as the original module test.
    _run_case(k1, batch=2, seq=8, nx=32, nf=64, num_bits=4, group_size=16,
              rtol=2e-2, atol=3e-3)

    # Slightly larger (still tiny, ~2 MiB weight) config that exercises the
    # real tiling: 2 parallel M tiles, 2 K-reduction steps with accumulator
    # init/finalize, and multi-group quant tiles.  bf16 MXU path -> looser tol.
    _run_case(k2, batch=4, seq=128, nx=1024, nf=512, num_bits=4, group_size=32,
              rtol=2e-2, atol=2e-2)

    print("KERNEL_OK")
</pallas_src>

<mosaic_0001>
module attributes {stable_mosaic.version = 11 : i64} {
  func.func @_quant_dequant_kernel(%arg0: i32, %arg1: i32, %arg2: memref<32x64xf32, #tpu.memory_space<vmem>>, %arg3: memref<32x64xf32, #tpu.memory_space<vmem>>, %arg4: memref<2x64xf32, #tpu.memory_space<vmem>>, %arg5: memref<2x64xf32, #tpu.memory_space<vmem>>, %arg6: memref<32x64xbf16, #tpu.memory_space<vmem>>) attributes {dimension_semantics = [#tpu.dimension_semantics<parallel>, #tpu.dimension_semantics<parallel>], iteration_bounds = array<i64: 1, 1>, scalar_prefetch = 0 : i64, scratch_operands = 0 : i64, tpu.core_type = #tpu.core_type<tc>, window_params = [{transform_indices = @transform_0, window_bounds = array<i64: 32, 64>}, {transform_indices = @transform_1, window_bounds = array<i64: 32, 64>}, {transform_indices = @transform_2, window_bounds = array<i64: 2, 64>}, {transform_indices = @transform_3, window_bounds = array<i64: 2, 64>}, {transform_indices = @transform_4, window_bounds = array<i64: 32, 64>}]} {
    %c0 = arith.constant 0 : index
    %c0_0 = arith.constant 0 : index
    %0 = vector.load %arg2[%c0, %c0_0] : memref<32x64xf32, #tpu.memory_space<vmem>>, vector<16x64xf32>
    %c0_1 = arith.constant 0 : index
    %c0_2 = arith.constant 0 : index
    %1 = vector.load %arg3[%c0_1, %c0_2] : memref<32x64xf32, #tpu.memory_space<vmem>>, vector<16x64xf32>
    %c0_3 = arith.constant 0 : index
    %c0_4 = arith.constant 0 : index
    %2 = vector.load %arg4[%c0_3, %c0_4] : memref<2x64xf32, #tpu.memory_space<vmem>>, vector<1x64xf32>
    %cst = arith.constant 0.000000e+00 : f32
    %cst_5 = arith.constant 1.000000e+00 : f32
    %3 = vector.broadcast %cst : f32 to vector<1x64xf32>
    %4 = arith.maximumf %3, %2 : vector<1x64xf32>
    %5 = vector.broadcast %cst_5 : f32 to vector<1x64xf32>
    %6 = arith.minimumf %5, %4 : vector<1x64xf32>
    %c0_6 = arith.constant 0 : index
    %c0_7 = arith.constant 0 : index
    %7 = vector.load %arg5[%c0_6, %c0_7] : memref<2x64xf32, #tpu.memory_space<vmem>>, vector<1x64xf32>
    %cst_8 = arith.constant 0.000000e+00 : f32
    %cst_9 = arith.constant 1.000000e+00 : f32
    %8 = vector.broadcast %cst_8 : f32 to vector<1x64xf32>
    %9 = arith.maximumf %8, %7 : vector<1x64xf32>
    %10 = vector.broadcast %cst_9 : f32 to vector<1x64xf32>
    %11 = arith.minimumf %10, %9 : vector<1x64xf32>
    %cst_10 = arith.constant dense<0x7F800000> : vector<64xf32>
    %12 = vector.multi_reduction <minimumf>, %0, %cst_10 [0] : vector<16x64xf32> to vector<64xf32>
    %13 = vector.shape_cast %12 : vector<64xf32> to vector<1x64xf32>
    %cst_11 = arith.constant 0.000000e+00 : f32
    %14 = vector.broadcast %cst_11 : f32 to vector<1x64xf32>
    %15 = arith.minimumf %13, %14 : vector<1x64xf32>
    %16 = arith.mulf %15, %6 : vector<1x64xf32>
    %cst_12 = arith.constant dense<0xFF800000> : vector<64xf32>
    %17 = vector.multi_reduction <maximumf>, %0, %cst_12 [0] : vector<16x64xf32> to vector<64xf32>
    %18 = vector.shape_cast %17 : vector<64xf32> to vector<1x64xf32>
    %cst_13 = arith.constant 0.000000e+00 : f32
    %19 = vector.broadcast %cst_13 : f32 to vector<1x64xf32>
    %20 = arith.maximumf %18, %19 : vector<1x64xf32>
    %21 = arith.mulf %20, %11 : vector<1x64xf32>
    %22 = arith.maximumf %21, %16 : vector<1x64xf32>
    %23 = arith.minimumf %21, %16 : vector<1x64xf32>
    %cst_14 = arith.constant 0.000000e+00 : f32
    %24 = vector.broadcast %cst_14 : f32 to vector<1x64xf32>
    %25 = arith.cmpf oeq, %23, %24 : vector<1x64xf32>
    %cst_15 = arith.constant 0.000000e+00 : f32
    %26 = vector.broadcast %cst_15 : f32 to vector<1x64xf32>
    %27 = arith.cmpf oeq, %22, %26 : vector<1x64xf32>
    %28 = arith.andi %25, %27 : vector<1x64xi1>
    %cst_16 = arith.constant -1.000000e+00 : f32
    %29 = vector.broadcast %cst_16 : f32 to vector<1x64xf32>
    %30 = arith.select %28, %29, %23 : vector<1x64xi1>, vector<1x64xf32>
    %cst_17 = arith.constant 1.000000e+00 : f32
    %31 = vector.broadcast %cst_17 : f32 to vector<1x64xf32>
    %32 = arith.select %28, %31, %22 : vector<1x64xi1>, vector<1x64xf32>
    %33 = arith.subf %32, %30 : vector<1x64xf32>
    %cst_18 = arith.constant 1.500000e+01 : f32
    %34 = vector.broadcast %cst_18 : f32 to vector<1x64xf32>
    %35 = arith.divf %33, %34 : vector<1x64xf32>
    %36 = tpu.bitcast %35 : vector<1x64xf32> -> vector<1x64xi32>
    %c13_i32 = arith.constant 13 : i32
    %37 = vector.broadcast %c13_i32 : i32 to vector<1x64xi32>
    %38 = arith.shrui %36, %37 : vector<1x64xi32>
    %c1_i32 = arith.constant 1 : i32
    %39 = vector.broadcast %c1_i32 : i32 to vector<1x64xi32>
    %40 = arith.andi %38, %39 : vector<1x64xi32>
    %c4095_i32 = arith.constant 4095 : i32
    %41 = vector.broadcast %c4095_i32 : i32 to vector<1x64xi32>
    %42 = arith.addi %36, %41 : vector<1x64xi32>
    %43 = arith.addi %42, %40 : vector<1x64xi32>
    %c-8192_i32 = arith.constant -8192 : i32
    %44 = vector.broadcast %c-8192_i32 : i32 to vector<1x64xi32>
    %45 = arith.andi %43, %44 : vector<1x64xi32>
    %46 = tpu.bitcast %45 : vector<1x64xi32> -> vector<1x64xf32>
    %cst_19 = arith.constant 0.000000e+00 : f32
    %47 = vector.broadcast %cst_19 : f32 to vector<1x64xf32>
    %48 = arith.subf %47, %30 : vector<1x64xf32>
    %49 = arith.divf %48, %46 : vector<1x64xf32>
    %50 = math.roundeven %49 : vector<1x64xf32>
    %51 = vector.broadcast %46 : vector<1x64xf32> to vector<16x64xf32>
    %52 = arith.divf %0, %51 : vector<16x64xf32>
    %53 = arith.addf %52, %1 : vector<16x64xf32>
    %54 = math.roundeven %53 : vector<16x64xf32>
    %55 = vector.broadcast %50 : vector<1x64xf32> to vector<16x64xf32>
    %56 = arith.addf %54, %55 : vector<16x64xf32>
    %cst_20 = arith.constant 0.000000e+00 : f32
    %cst_21 = arith.constant 1.500000e+01 : f32
    %57 = vector.broadcast %cst_20 : f32 to vector<16x64xf32>
    %58 = arith.maximumf %57, %56 : vector<16x64xf32>
    %59 = vector.broadcast %cst_21 : f32 to vector<16x64xf32>
    %60 = arith.minimumf %59, %58 : vector<16x64xf32>
    %61 = vector.broadcast %50 : vector<1x64xf32> to vector<16x64xf32>
    %62 = arith.subf %60, %61 : vector<16x64xf32>
    %63 = vector.broadcast %46 : vector<1x64xf32> to vector<16x64xf32>
    %64 = arith.mulf %63, %62 : vector<16x64xf32>
    %65 = arith.truncf %64 : vector<16x64xf32> to vector<16x64xbf16>
    %c0_22 = arith.constant 0 : index
    %c0_23 = arith.constant 0 : index
    %66 = vector.load %arg6[%c0_22, %c0_23] : memref<32x64xbf16, #tpu.memory_space<vmem>>, vector<16x64xbf16>
    tpu.vector_store %arg6[%c0_22, %c0_23], %65 {strides = array<i32>} : memref<32x64xbf16, #tpu.memory_space<vmem>>, vector<16x64xbf16>,
    %c16 = arith.constant 16 : index
    %c0_24 = arith.constant 0 : index
    %67 = vector.load %arg2[%c16, %c0_24] : memref<32x64xf32, #tpu.memory_space<vmem>>, vector<16x64xf32>
    %c16_25 = arith.constant 16 : index
    %c0_26 = arith.constant 0 : index
    %68 = vector.load %arg3[%c16_25, %c0_26] : memref<32x64xf32, #tpu.memory_space<vmem>>, vector<16x64xf32>
    %c1 = arith.constant 1 : index
    %c0_27 = arith.constant 0 : index
    %69 = vector.load %arg4[%c1, %c0_27] : memref<2x64xf32, #tpu.memory_space<vmem>>, vector<1x64xf32>
    %cst_28 = arith.constant 0.000000e+00 : f32
    %cst_29 = arith.constant 1.000000e+00 : f32
    %70 = vector.broadcast %cst_28 : f32 to vector<1x64xf32>
    %71 = arith.maximumf %70, %69 : vector<1x64xf32>
    %72 = vector.broadcast %cst_29 : f32 to vector<1x64xf32>
    %73 = arith.minimumf %72, %71 : vector<1x64xf32>
    %c1_30 = arith.constant 1 : index
    %c0_31 = arith.constant 0 : index
    %74 = vector.load %arg5[%c1_30, %c0_31] : memref<2x64xf32, #tpu.memory_space<vmem>>, vector<1x64xf32>
    %cst_32 = arith.constant 0.000000e+00 : f32
    %cst_33 = arith.constant 1.000000e+00 : f32
    %75 = vector.broadcast %cst_32 : f32 to vector<1x64xf32>
    %76 = arith.maximumf %75, %74 : vector<1x64xf32>
    %77 = vector.broadcast %cst_33 : f32 to vector<1x64xf32>
    %78 = arith.minimumf %77, %76 : vector<1x64xf32>
    %cst_34 = arith.constant dense<0x7F800000> : vector<64xf32>
    %79 = vector.multi_reduction <minimumf>, %67, %cst_34 [0] : vector<16x64xf32> to vector<64xf32>
    %80 = vector.shape_cast %79 : vector<64xf32> to vector<1x64xf32>
    %cst_35 = arith.constant 0.000000e+00 : f32
    %81 = vector.broadcast %cst_35 : f32 to vector<1x64xf32>
    %82 = arith.minimumf %80, %81 : vector<1x64xf32>
    %83 = arith.mulf %82, %73 : vector<1x64xf32>
    %cst_36 = arith.constant dense<0xFF800000> : vector<64xf32>
    %84 = vector.multi_reduction <maximumf>, %67, %cst_36 [0] : vector<16x64xf32> to vector<64xf32>
    %85 = vector.shape_cast %84 : vector<64xf32> to vector<1x64xf32>
    %cst_37 = arith.constant 0.000000e+00 : f32
    %86 = vector.broadcast %cst_37 : f32 to vector<1x64xf32>
    %87 = arith.maximumf %85, %86 : vector<1x64xf32>
    %88 = arith.mulf %87, %78 : vector<1x64xf32>
    %89 = arith.maximumf %88, %83 : vector<1x64xf32>
    %90 = arith.minimumf %88, %83 : vector<1x64xf32>
    %cst_38 = arith.constant 0.000000e+00 : f32
    %91 = vector.broadcast %cst_38 : f32 to vector<1x64xf32>
    %92 = arith.cmpf oeq, %90, %91 : vector<1x64xf32>
    %cst_39 = arith.constant 0.000000e+00 : f32
    %93 = vector.broadcast %cst_39 : f32 to vector<1x64xf32>
    %94 = arith.cmpf oeq, %89, %93 : vector<1x64xf32>
    %95 = arith.andi %92, %94 : vector<1x64xi1>
    %cst_40 = arith.constant -1.000000e+00 : f32
    %96 = vector.broadcast %cst_40 : f32 to vector<1x64xf32>
    %97 = arith.select %95, %96, %90 : vector<1x64xi1>, vector<1x64xf32>
    %cst_41 = arith.constant 1.000000e+00 : f32
    %98 = vector.broadcast %cst_41 : f32 to vector<1x64xf32>
    %99 = arith.select %95, %98, %89 : vector<1x64xi1>, vector<1x64xf32>
    %100 = arith.subf %99, %97 : vector<1x64xf32>
    %cst_42 = arith.constant 1.500000e+01 : f32
    %101 = vector.broadcast %cst_42 : f32 to vector<1x64xf32>
    %102 = arith.divf %100, %101 : vector<1x64xf32>
    %103 = tpu.bitcast %102 : vector<1x64xf32> -> vector<1x64xi32>
    %c13_i32_43 = arith.constant 13 : i32
    %104 = vector.broadcast %c13_i32_43 : i32 to vector<1x64xi32>
    %105 = arith.shrui %103, %104 : vector<1x64xi32>
    %c1_i32_44 = arith.constant 1 : i32
    %106 = vector.broadcast %c1_i32_44 : i32 to vector<1x64xi32>
    %107 = arith.andi %105, %106 : vector<1x64xi32>
    %c4095_i32_45 = arith.constant 4095 : i32
    %108 = vector.broadcast %c4095_i32_45 : i32 to vector<1x64xi32>
    %109 = arith.addi %103, %108 : vector<1x64xi32>
    %110 = arith.addi %109, %107 : vector<1x64xi32>
    %c-8192_i32_46 = arith.constant -8192 : i32
    %111 = vector.broadcast %c-8192_i32_46 : i32 to vector<1x64xi32>
    %112 = arith.andi %110, %111 : vector<1x64xi32>
    %113 = tpu.bitcast %112 : vector<1x64xi32> -> vector<1x64xf32>
    %cst_47 = arith.constant 0.000000e+00 : f32
    %114 = vector.broadcast %cst_47 : f32 to vector<1x64xf32>
    %115 = arith.subf %114, %97 : vector<1x64xf32>
    %116 = arith.divf %115, %113 : vector<1x64xf32>
    %117 = math.roundeven %116 : vector<1x64xf32>
    %118 = vector.broadcast %113 : vector<1x64xf32> to vector<16x64xf32>
    %119 = arith.divf %67, %118 : vector<16x64xf32>
    %120 = arith.addf %119, %68 : vector<16x64xf32>
    %121 = math.roundeven %120 : vector<16x64xf32>
    %122 = vector.broadcast %117 : vector<1x64xf32> to vector<16x64xf32>
    %123 = arith.addf %121, %122 : vector<16x64xf32>
    %cst_48 = arith.constant 0.000000e+00 : f32
    %cst_49 = arith.constant 1.500000e+01 : f32
    %124 = vector.broadcast %cst_48 : f32 to vector<16x64xf32>
    %125 = arith.maximumf %124, %123 : vector<16x64xf32>
    %126 = vector.broadcast %cst_49 : f32 to vector<16x64xf32>
    %127 = arith.minimumf %126, %125 : vector<16x64xf32>
    %128 = vector.broadcast %117 : vector<1x64xf32> to vector<16x64xf32>
    %129 = arith.subf %127, %128 : vector<16x64xf32>
    %130 = vector.broadcast %113 : vector<1x64xf32> to vector<16x64xf32>
    %131 = arith.mulf %130, %129 : vector<16x64xf32>
    %132 = arith.truncf %131 : vector<16x64xf32> to vector<16x64xbf16>
    %c16_50 = arith.constant 16 : index
    %c0_51 = arith.constant 0 : index
    %133 = vector.load %arg6[%c16_50, %c0_51] : memref<32x64xbf16, #tpu.memory_space<vmem>>, vector<16x64xbf16>
    tpu.vector_store %arg6[%c16_50, %c0_51], %132 {strides = array<i32>} : memref<32x64xbf16, #tpu.memory_space<vmem>>, vector<16x64xbf16>,
    return
  }
  func.func @transform_0(%arg0: i32, %arg1: i32) -> (i32, i32) {
    %c0_i32 = arith.constant 0 : i32
    return %arg0, %arg1 : i32, i32
  }
  func.func @transform_1(%arg0: i32, %arg1: i32) -> (i32, i32) {
    %c0_i32 = arith.constant 0 : i32
    return %arg0, %arg1 : i32, i32
  }
  func.func @transform_2(%arg0: i32, %arg1: i32) -> (i32, i32) {
    %c0_i32 = arith.constant 0 : i32
    return %arg0, %arg1 : i32, i32
  }
  func.func @transform_3(%arg0: i32, %arg1: i32) -> (i32, i32) {
    %c0_i32 = arith.constant 0 : i32
    return %arg0, %arg1 : i32, i32
  }
  func.func @transform_4(%arg0: i32, %arg1: i32) -> (i32, i32) {
    %c0_i32 = arith.constant 0 : i32
    return %arg0, %arg1 : i32, i32
  }
}

</mosaic_0001>

<bundles_post_ra>
// kernel: tpu_custom_call.1
= control target key start
LH: loop header
LB: loop body
LE: loop exit
PB: predicated region body
PF: predicated region fallthrough
CT: control target
= control target key end

     0   :  { %9 = vsyncpa [#allocation3], 0  ;;  %s454_s0 = inlined_call_operand.hbm [shape: f32[32,64], index: 0, kind: input, shape index: {}]   ;;  %s455_s1 = inlined_call_operand.hbm [shape: f32[32,64], index: 1, kind: input, shape index: {}]   ;;  %s456_s2 = inlined_call_operand.vmem [shape: f32[2,64], index: 2, kind: input, shape index: {}]   ;;  %s457_s3 = inlined_call_operand.vmem [shape: f32[2,64], index: 3, kind: input, shape index: {}]   ;;  %s458_s4 = inlined_call_operand.hbm [shape: bf16[32,64], index: 4, kind: output, shape index: {}]  }
   0x1   :  { %10 = vsyncpa [#allocation6], 0 }
   0x2   :  { %11 = vsyncpa [#allocation4], 0  ;;  %s342_s15 = smov [#allocation2]   ;;  %s270_s19 = scalar_lea.hbm %s454_s0, 512 }
   0x3   :  { %s17_s16 = sshll.u32 %s342_s15, 4  ;;  %p271_p0 = scmp.ne.s32.totalorder %s454_s0, %s270_s19  ;;  %s18_s16 = int_to_ptr.vmem [resolvable:$true] %s17_s16 }
   0x4   :  { %p274_p1 = scmp.lt.u32.totalorder %s270_s19, %s454_s0 }
   0x6   :  { %p276_p2 = pnand %p274_p1, %p271_p0 }
   0x8   :  { %279 = shalt.err (!%p276_p2)
}
   0x9   :  { %s280_s24 = scalar_lea.vmem %s18_s16, 512  ;;  %p285_p4 = scmp.lt.s32.totalorder %s18_s16, %s18_s16 }
   0xa   :  { %p281_p3 = scmp.ne.s32.totalorder %s18_s16, %s280_s24  ;;  %p286_p5 = scmp.lt.s32.totalorder %s280_s24, %s280_s24 }
   0xc   :  { %p287_p6 = por %p286_p5, %p285_p4 }
   0xe   :  { %p288_p7 = pnand %p287_p6, %p281_p3 }
  0x10   :  { %291 = shalt.err (!%p288_p7)
}
  0x11   :  { %s343_s25 = smov 128   ;;  %s344_s26 = smov 8  }
  0x12   :  { %23 = dma.hbm_to_vmem [thread:$0]  %s454_s0, 512, %s18_s16, [#allocation3], %s343_s25, %s343_s25, %s344_s26  }
  0x13   :  { %s345_s29 = smov [#allocation5]   ;;  %s292_s7 = scalar_lea.hbm %s455_s1, 512 }
  0x14   :  { %s29_s30 = sshll.u32 %s345_s29, 4  ;;  %p293_p8 = scmp.ne.s32.totalorder %s455_s1, %s292_s7  ;;  %s30_s30 = int_to_ptr.vmem [resolvable:$true] %s29_s30 }
  0x15   :  { %p296_p9 = scmp.lt.u32.totalorder %s292_s7, %s455_s1 }
  0x17   :  { %p298_p10 = pnand %p296_p9, %p293_p8 }
  0x19   :  { %301 = shalt.err (!%p298_p10)
}
  0x1a   :  { %s302_s12 = scalar_lea.vmem %s30_s30, 512  ;;  %p307_p12 = scmp.lt.s32.totalorder %s30_s30, %s30_s30 }
  0x1b   :  { %p303_p11 = scmp.ne.s32.totalorder %s30_s30, %s302_s12  ;;  %p308_p13 = scmp.lt.s32.totalorder %s302_s12, %s302_s12 }
  0x1d   :  { %p309_p0 = por %p308_p13, %p307_p12 }
  0x1f   :  { %p310_p1 = pnand %p309_p0, %p303_p11 }
  0x21   :  { %313 = shalt.err (!%p310_p1)
}
  0x22   :  { %35 = dma.hbm_to_vmem [thread:$0]  %s455_s1, 512, %s30_s30, [#allocation6], %s343_s25, %s343_s25, %s344_s26  }
  0x23   :  { %336 = dma.done.wait [#allocation3], 512  }
  0x24   :  { %337 = vsyncadd [#allocation3], 4294966784 }
  0x25   :  { %338 = dma.done.wait [#allocation6], 512  }
  0x26   :  { %339 = vsyncadd [#allocation6], 4294966784  ;;  %vm56_vm0 = vcmask 523264   ;;  %v398_v0 = vld [vmem:[#allocation2] sm:$0xff]  ;;  %v400_v1 = vld [vmem:[#allocation2 + $0x8] sm:$0xff]  ;;  %vm133_vm7 = vcmask 519168  }
  0x27   :  { %v57_v2 = vsel %vm56_vm0, %v398_v0, inf  ;;  %v58_v3 = vsel %vm56_vm0, %v400_v1, inf  ;;  %v68_v5 = vsel %vm56_vm0, %v398_v0, -inf  ;;  %v408_v6 = vld [vmem:[#allocation2 + $0x10] sm:$0xff]  ;;  %v410_v7 = vld [vmem:[#allocation2 + $0x18] sm:$0xff]  ;;  %v69_v8 = vsel %vm56_vm0, %v400_v1, -inf }
  0x28   :  { %v59_v4 = vmin.f32 %v57_v2, %v58_v3  ;;  %v70_v10 = vmax.f32 %v68_v5, %v69_v8  ;;  %v146_v11 = vsel %vm56_vm0, %v408_v6, inf  ;;  %v147_v12 = vsel %vm56_vm0, %v410_v7, inf  ;;  %v50_v13 = vld [vmem:[%s456_s2] sm:$0x1]  ;;  %v140_v27 = vld [vmem:[%s456_s2 + $0x1] sm:$0x1] }
  0x29   :  { %v148_v16 = vmin.f32 %v146_v11, %v147_v12  ;;  %v157_v17 = vsel %vm56_vm0, %v408_v6, -inf  ;;  %v158_v18 = vsel %vm56_vm0, %v410_v7, -inf  ;;  %v53_v19 = vld [vmem:[%s457_s3] sm:$0x1]  ;;  %v51_v24 = vmax.f32 %v50_v13, 0.0  ;;  %s346_s2 = smov [#allocation7]  }
  0x2a   :  { %v60_v9 = vrot.slane %v59_v4, 4  ;;  %v71_v15 = vrot.slane %v70_v10, 4  ;;  %v159_v23 = vmax.f32 %v157_v17, %v158_v18  ;;  %v54_v30 = vmax.f32 %v53_v19, 0.0  ;;  %v143_v33 = vld [vmem:[%s457_s3 + $0x1] sm:$0x1]  ;;  %s228_s3 = sshll.u32 %s346_s2, 4  ;;  %s229_s3 = int_to_ptr.vmem [resolvable:$true] %s228_s3 }
  0x2b   :  { %v149_v22 = vrot.slane %v148_v16, 4  ;;  %v52_v36 = vmin.f32 %v51_v24, 1.0  ;;  %v141_v37 = vmax.f32 %v140_v27, 0.0  ;;  %v144_v43 = vmax.f32 %v143_v33, 0.0  ;;  %v49_v33 = vld [vmem:[#allocation5 + $0x8] sm:$0xff]  ;;  %s314_s21 = scalar_lea.vmem %s229_s3, 256  ;;  %p319_p3 = scmp.lt.s32.totalorder %s229_s3, %s229_s3 }
  0x2c   :  { %v61_v14 = vmin.f32 %v59_v4, %v60_v9  ;;  %v72_v21 = vmax.f32 %v70_v10, %v71_v15  ;;  %v160_v29 = vrot.slane %v159_v23, 4  ;;  %v55_v42 = vmin.f32 %v54_v30, 1.0  ;;  %p315_p2 = scmp.ne.s32.totalorder %s229_s3, %s314_s21  ;;  %p320_p4 = scmp.lt.s32.totalorder %s314_s21, %s314_s21 }
  0x2d   :  { %v150_v28 = vmin.f32 %v148_v16, %v149_v22  ;;  %v142_v48 = vmin.f32 %v141_v37, 1.0  ;;  %v145_v54 = vmin.f32 %v144_v43, 1.0  ;;  %v100_v5 = vlaneseq  ;;  %v138_v43 = vld [vmem:[#allocation5 + $0x10] sm:$0xff] }
  0x2e   :  { %v62_v20 = vrot.slane %v61_v14, 2  ;;  %v73_v26 = vrot.slane %v72_v21, 2  ;;  %v161_v35 = vmax.f32 %v159_v23, %v160_v29  ;;  %p321_p5 = por %p320_p4, %p319_p3 }
  0x2f   :  { %v151_v34 = vrot.slane %v150_v28, 2  ;;  %v101_v13 = vshrl.u32 %v100_v5, 7 }
  0x30   :  { %v63_v25 = vmin.f32 %v61_v14, %v62_v20  ;;  %v74_v32 = vmax.f32 %v72_v21, %v73_v26  ;;  %v162_v41 = vrot.slane %v161_v35, 2  ;;  %p322_p6 = pnand %p321_p5, %p315_p2 }
  0x31   :  { %v152_v40 = vmin.f32 %v150_v28, %v151_v34  ;;  %v102_v18 = vsub.s32 0, %v101_v13 }
  0x32   :  { %v64_v31 = vrot.slane %v63_v25, 1  ;;  %v75_v39 = vrot.slane %v74_v32, 1  ;;  %v163_v47 = vmax.f32 %v161_v35, %v162_v41 }
  0x33   :  { %v153_v46 = vrot.slane %v152_v40, 1 }
  0x34   :  { %v65_v38 = vmin.f32 %v63_v25, %v64_v31  ;;  %v76_v45 = vmax.f32 %v74_v32, %v75_v39  ;;  %v164_v52 = vrot.slane %v163_v47, 1  ;;  %v48_v32 = vld [vmem:[#allocation5] sm:$0xff] }
  0x35   :  { %v154_v51 = vmin.f32 %v152_v40, %v153_v46 }
  0x36   :  { %v66_v44 = vmin.f32 %v65_v38, 0.0  ;;  %v77_v50 = vmax.f32 %v76_v45, 0.0  ;;  %v165_v56 = vmax.f32 %v163_v47, %v164_v52 }
  0x37   :  { %v155_v55 = vmin.f32 %v154_v51, 0.0 }
  0x38   :  { %v67_v49 = vmul.f32 %v66_v44, %v52_v36  ;;  %v78_v53 = vmul.f32 %v77_v50, %v55_v42  ;;  %v166_v60 = vmax.f32 %v165_v56, 0.0 }
  0x39   :  { %v156_v59 = vmul.f32 %v155_v55, %v142_v48  ;;  %v139_v48 = vld [vmem:[#allocation5 + $0x18] sm:$0xff] }
  0x3a   :  { %v79_v57 = vmax.f32 %v78_v53, %v67_v49  ;;  %v80_v58 = vmin.f32 %v78_v53, %v67_v49  ;;  %v167_v61 = vmul.f32 %v166_v60, %v145_v54 }
  0x3c   :  { %vm81_vm1 = vcmp.eq.f32.partialorder %v80_v58, 0.0  ;;  %vm82_vm2 = vcmp.eq.f32.partialorder %v79_v57, 0.0  ;;  %v168_v2 = vmax.f32 %v167_v61, %v156_v59  ;;  %v169_v3 = vmin.f32 %v167_v61, %v156_v59 }
  0x3d   :  { %vm83_vm3 = vmand %vm81_vm1, %vm82_vm2 }
  0x3e   :  { %v84_v62 = vsel %vm83_vm3, -1.0, %v80_v58  ;;  %v85_v63 = vsel %vm83_vm3, 1.0, %v79_v57  ;;  %vm170_vm4 = vcmp.eq.f32.partialorder %v169_v3, 0.0  ;;  %vm171_vm5 = vcmp.eq.f32.partialorder %v168_v2, 0.0 }
  0x3f   :  { %v86_v4 = vsub.f32 %v85_v63, %v84_v62  ;;  %vm172_vm6 = vmand %vm170_vm4, %vm171_vm5  ;;  %v96_v27 = vsub.f32 0.0, %v84_v62 }
  0x40   :  { %v173_v9 = vsel %vm172_vm6, -1.0, %v169_v3  ;;  %v174_v10 = vsel %vm172_vm6, 1.0, %v168_v2 }
  0x41   :  { %v88_v8 = vmul.f32 0.06666667, %v86_v4  ;;  %v175_v14 = vsub.f32 %v174_v10, %v173_v9  ;;  %v184_v30 = vsub.f32 0.0, %v173_v9 }
  0x43   :  { %v90_v11 = vshrl.u32 %v88_v8, 13  ;;  %v92_v12 = vadd.s32 4095, %v88_v8  ;;  %v176_v16 = vmul.f32 0.06666667, %v175_v14 }
  0x45   :  { %v91_v15 = vand.u32 1, %v90_v11  ;;  %v178_v19 = vshrl.u32 %v176_v16, 13  ;;  %v180_v20 = vadd.s32 4095, %v176_v16 }
  0x47   :  { %v93_v17 = vadd.s32 %v92_v12, %v91_v15  ;;  %v179_v22 = vand.u32 1, %v178_v19 }
  0x49   :  { %v94_v21 = vand.u32 4294959104, %v93_v17  ;;  %v181_v24 = vadd.s32 %v180_v20, %v179_v22 }
  0x4b   :  { %262 = vrcp.f32 %v94_v21  ;;  %v103_v23 = vrot.slane %v94_v21, %v102_v18  ;;  %v182_v25 = vand.u32 4294959104, %v181_v24 }
  0x4d   :  { %264 = vrcp.f32 %v103_v23  ;;  %v191_v26 = vrot.slane %v182_v25, %v102_v18 }
  0x4e   :  { %266 = vrcp.f32 %v182_v25 }
  0x4f   :  { %268 = vrcp.f32 %v191_v26 }
  0x55   :  { %v263_v28 = vpop.eup %262 }
  0x56   :  { %v98_v29 = vmul.f32 %v263_v28, %v96_v27 }
  0x57   :  { %v265_v31 = vpop.eup %264 }
  0x58   :  { %v249_v34 = vround.rtne.f32 %v98_v29  ;;  %v105_v35 = vmul.f32 %v265_v31, %v398_v0  ;;  %v106_v36 = vmul.f32 %v265_v31, %v400_v1  ;;  %v267_v37 = vpop.eup %266 }
  0x59   :  { %v186_v41 = vmul.f32 %v267_v37, %v184_v30  ;;  %v269_v42 = vpop.eup %268 }
  0x5a   :  { %v107_v38 = vadd.f32 %v105_v35, %v48_v32  ;;  %v114_v39 = vrot.slane %v249_v34, %v102_v18  ;;  %v108_v40 = vadd.f32 %v106_v36, %v49_v33  ;;  %v193_v47 = vmul.f32 %v269_v42, %v408_v6 }
  0x5b   :  { %v252_v46 = vround.rtne.f32 %v186_v41  ;;  %v194_v49 = vmul.f32 %v269_v42, %v410_v7 }
  0x5c   :  { %v250_v44 = vround.rtne.f32 %v107_v38  ;;  %v251_v45 = vround.rtne.f32 %v108_v40  ;;  %v195_v0 = vadd.f32 %v193_v47, %v138_v43 }
  0x5d   :  { %v202_v52 = vrot.slane %v252_v46, %v102_v18  ;;  %v196_v1 = vadd.f32 %v194_v49, %v139_v48 }
  0x5e   :  { %v115_v50 = vadd.f32 %v250_v44, %v114_v39  ;;  %v116_v51 = vadd.f32 %v251_v45, %v114_v39  ;;  %v253_v55 = vround.rtne.f32 %v195_v0 }
  0x5f   :  { %v254_v56 = vround.rtne.f32 %v196_v1 }
  0x60   :  { %v117_v53 = vmax.f32 %v115_v50, 0.0  ;;  %v118_v54 = vmax.f32 %v116_v51, 0.0  ;;  %v203_v59 = vadd.f32 %v253_v55, %v202_v52 }
  0x61   :  { %v204_v60 = vadd.f32 %v254_v56, %v202_v52 }
  0x62   :  { %v119_v57 = vmin.f32 %v117_v53, 15.0  ;;  %v120_v58 = vmin.f32 %v118_v54, 15.0  ;;  %v205_v63 = vmax.f32 %v203_v59, 0.0 }
  0x63   :  { %v206_v6 = vmax.f32 %v204_v60, 0.0 }
  0x64   :  { %v121_v61 = vsub.f32 %v119_v57, %v114_v39  ;;  %v122_v62 = vsub.f32 %v120_v58, %v114_v39  ;;  %v207_v7 = vmin.f32 %v205_v63, 15.0 }
  0x65   :  { %v208_v4 = vmin.f32 %v206_v6, 15.0 }
  0x66   :  { %v123_v2 = vmul.f32 %v121_v61, %v103_v23  ;;  %v124_v3 = vmul.f32 %v122_v62, %v103_v23  ;;  %v209_v9 = vsub.f32 %v207_v7, %v202_v52 }
  0x67   :  { %v210_v10 = vsub.f32 %v208_v4, %v202_v52 }
  0x68   :  { %v245_v5 = vpack.c.bf16 %v123_v2, %v123_v2  ;;  %v246_v8 = vpack.c.bf16 %v124_v3, %v124_v3  ;;  %v211_v11 = vmul.f32 %v209_v9, %v191_v26 }
  0x69   :  { %v212_v12 = vmul.f32 %v210_v10, %v191_v26 }
  0x6a   :  { %134 = vst.msk [vmem:[#allocation7] sm:$0xf] %vm133_vm7, %v245_v5  ;;  %135 = vst.msk [vmem:[#allocation7 + $0x4] sm:$0xf] %vm133_vm7, %v246_v8  ;;  %v247_v13 = vpack.c.bf16 %v211_v11, %v211_v11 }
  0x6b   :  { %v248_v14 = vpack.c.bf16 %v212_v12, %v212_v12 }
  0x6c   :  { %221 = vst.msk [vmem:[#allocation7 + $0x8] sm:$0xf] %vm133_vm7, %v247_v13 }
  0x6d   :  { %222 = vst.msk [vmem:[#allocation7 + $0xc] sm:$0xf] %vm133_vm7, %v248_v14 }
  0x6e   :  { %325 = shalt.err (!%p322_p6)
}
  0x6f   :  { %s326_s24 = scalar_lea.hbm %s458_s4, 256 }
  0x70   :  { %p327_p7 = scmp.ne.s32.totalorder %s458_s4, %s326_s24  ;;  %p330_p8 = scmp.lt.u32.totalorder %s326_s24, %s458_s4 }
  0x72   :  { %p332_p9 = pnand %p330_p8, %p327_p7 }
  0x74   :  { %335 = shalt.err (!%p332_p9)
}
  0x75   :  { %s347_s29 = smov 64   ;;  %s348_s30 = smov 4  }
  0x76   :  { %234 = dma.vmem_to_hbm [thread:$0]  %s229_s3, 256, %s458_s4, [#allocation4], %s347_s29, %s347_s29, %s348_s30  }
  0x77   :  { %340 = dma.done.wait [#allocation4], 256  }
  0x78   :  { %341 = vsyncadd [#allocation4], 4294967040 }
  0x79   :  { %238 = vsyncpa [#allocation3], 1 }
  0x7a   :  { %239 = vsyncpa [#allocation6], 1 }
  0x7b   :  { %240 = vsyncpa [#allocation4], 1 }

</bundles_post_ra>
